<compile_context>
chip_gen: v5e
topology: v5e:2x2
jax: 0.10.0
libtpu: 0.0.40
codegen_flags: <defaults>
</compile_context>

<pallas_src>
import jax
import jax.numpy as jnp
from jax.experimental import pallas as pl
from jax.experimental.pallas import tpu as pltpu


def _round_up(x, m):
    return ((x + m - 1) // m) * m


def _mlp_kernel(x_ref, w1_ref, b1_ref, w2_ref, b2_ref, o_ref):
    # x_ref:  [TILE_B, D_pad] bf16      (streamed per grid step)
    # w1_ref: [D_pad, H_pad]  bf16      (in-major, VMEM-resident)
    # b1_ref: [1, H_pad]      f32
    # w2_ref: [H_pad, C_pad]  bf16
    # b2_ref: [1, C_pad]      f32
    # o_ref:  [TILE_B, C_pad] f32
    h = jnp.dot(x_ref[...], w1_ref[...], preferred_element_type=jnp.float32)
    # Dropout with p=0 / eval mode is identity -> only ReLU remains.
    # TODO(synk): training-mode dropout (pltpu.prng_seed + prng_random_bits mask)
    # not implemented; inference semantics are reproduced exactly.
    h = jnp.maximum(h + b1_ref[...], 0.0)
    out = jnp.dot(h.astype(w2_ref.dtype), w2_ref[...],
                  preferred_element_type=jnp.float32)
    o_ref[...] = (out + b2_ref[...]).astype(o_ref.dtype)


def prepare_mlp_params(w1, b1, w2, b2):
    """One-time parameter prep (do this once and cache for repeated inference):
    transpose PyTorch [out, in] weights to in-major, zero-pad D/H/C to multiples
    of 128 lanes, cast weights to bf16 (biases stay f32)."""
    H, D = w1.shape
    C = w2.shape[0]
    D_pad = _round_up(D, 128)
    H_pad = _round_up(H, 128)
    C_pad = _round_up(C, 128)

    w1_t = (jnp.zeros((D_pad, H_pad), jnp.float32)
            .at[:D, :H].set(jnp.asarray(w1, jnp.float32).T)).astype(jnp.bfloat16)
    w2_t = (jnp.zeros((H_pad, C_pad), jnp.float32)
            .at[:H, :C].set(jnp.asarray(w2, jnp.float32).T)).astype(jnp.bfloat16)
    b1_p = jnp.zeros((1, H_pad), jnp.float32).at[0, :H].set(jnp.asarray(b1, jnp.float32))
    b2_p = jnp.zeros((1, C_pad), jnp.float32).at[0, :C].set(jnp.asarray(b2, jnp.float32))
    return w1_t, b1_p, w2_t, b2_p, (D, H, C, D_pad, H_pad, C_pad)


def mlp_uncertainty_apply(x, w1_t, b1_p, w2_t, b2_p, dims):
    """x: [B, inputdim]. Returns [B, nclasses] (f32)."""
    D, H, C, D_pad, H_pad, C_pad = dims
    B = x.shape[0]

    # --- tile sizing: budget for the smallest generation (v7x: 64 MiB VMEM/TC) ---
    weight_bytes = D_pad * H_pad * 2 + H_pad * C_pad * 2 + (H_pad + C_pad) * 4
    budget = 40 * 1024 * 1024                      # conservative working-set target
    per_row = 2 * (D_pad * 2 + C_pad * 4) + H_pad * 4   # dbl-buffered x/out + hidden
    tile_cap = max(8, ((budget - weight_bytes) // per_row) // 8 * 8)
    TILE_B = int(min(512, tile_cap, _round_up(B, 8)))
    B_pad = _round_up(B, TILE_B)
    grid = (B_pad // TILE_B,)

    # zero-pad x rows/cols (padded rows are sliced off the output afterwards)
    x_p = (jnp.zeros((B_pad, D_pad), jnp.bfloat16)
           .at[:B, :D].set(jnp.asarray(x, jnp.float32).astype(jnp.bfloat16)))

    flops = 2 * B_pad * (D_pad * H_pad + H_pad * C_pad)
    bytes_accessed = (x_p.size * 2 + w1_t.size * 2 + w2_t.size * 2
                      + (b1_p.size + b2_p.size) * 4 + B_pad * C_pad * 4)
    vmem_est = weight_bytes + TILE_B * per_row + 8 * 1024 * 1024
    vmem_limit = int(min(max(vmem_est, 32 * 1024 * 1024), 56 * 1024 * 1024))

    out_p = pl.pallas_call(
        _mlp_kernel,
        out_shape=jax.ShapeDtypeStruct((B_pad, C_pad), jnp.float32),
        grid=grid,
        in_specs=[
            pl.BlockSpec((TILE_B, D_pad), lambda i: (i, 0)),   # x: streamed
            pl.BlockSpec((D_pad, H_pad), lambda i: (0, 0)),    # W1: resident
            pl.BlockSpec((1, H_pad), lambda i: (0, 0)),        # b1: resident
            pl.BlockSpec((H_pad, C_pad), lambda i: (0, 0)),    # W2: resident
            pl.BlockSpec((1, C_pad), lambda i: (0, 0)),        # b2: resident
        ],
        out_specs=pl.BlockSpec((TILE_B, C_pad), lambda i: (i, 0)),
        compiler_params=pltpu.CompilerParams(
            dimension_semantics=("parallel",),
            vmem_limit_bytes=vmem_limit,
        ),
        cost_estimate=pl.CostEstimate(
            flops=flops, transcendentals=0, bytes_accessed=bytes_accessed),
    )(x_p, w1_t, b1_p, w2_t, b2_p)

    return out_p[:B, :C]


def mlp_uncertainty_forward(x, w1, b1, w2, b2):
    """Convenience wrapper: prep params + apply. For repeated inference, call
    prepare_mlp_params once and reuse the result with mlp_uncertainty_apply."""
    params = prepare_mlp_params(w1, b1, w2, b2)
    return mlp_uncertainty_apply(x, *params)


def _init_linear(key, out_dim, in_dim):
    # Deterministic init mirroring torch.nn.Linear default: U(-k, k), k=1/sqrt(in).
    kw, kb = jax.random.split(key)
    bound = 1.0 / (in_dim ** 0.5)
    w = jax.random.uniform(kw, (out_dim, in_dim), jnp.float32, -bound, bound)
    b = jax.random.uniform(kb, (out_dim,), jnp.float32, -bound, bound)
    return w, b


if __name__ == "__main__":
    # Small shapes consistent with the module's forward: x is [batch, inputdim].
    batch, inputdim, nhidden, nclasses = 8, 32, 32, 8

    key = jax.random.PRNGKey(0)
    kx, k1, k2 = jax.random.split(key, 3)

    x = jax.random.normal(kx, (batch, inputdim), jnp.float32)
    w1, b1 = _init_linear(k1, nhidden, inputdim)
    w2, b2 = _init_linear(k2, nclasses, nhidden)

    out = mlp_uncertainty_forward(x, w1, b1, w2, b2)
    out = jax.block_until_ready(out)
    assert out.shape == (batch, nclasses)

    # Reference with the same bf16-input / f32-accumulate numerics as the kernel.
    xb = x.astype(jnp.bfloat16)
    w1b = jnp.asarray(w1, jnp.float32).astype(jnp.bfloat16)
    w2b = jnp.asarray(w2, jnp.float32).astype(jnp.bfloat16)
    h_ref = jnp.maximum(
        jnp.dot(xb, w1b.T, preferred_element_type=jnp.float32) + b1, 0.0)
    ref_bf16 = jnp.dot(h_ref.astype(jnp.bfloat16), w2b.T,
                       preferred_element_type=jnp.float32) + b2
    assert jnp.allclose(out, ref_bf16, atol=2e-3, rtol=2e-3)

    # Loose check against the full-f32 reference (bf16 quantization tolerance).
    ref_f32 = jnp.maximum(x @ w1.T + b1, 0.0) @ w2.T + b2
    assert jnp.allclose(out, ref_f32, atol=5e-2, rtol=5e-2)

    print("KERNEL_OK")
</pallas_src>

<mosaic_0001>
module attributes {stable_mosaic.version = 11 : i64} {
  func.func @_mlp_kernel(%arg0: i32, %arg1: memref<8x128xbf16, #tpu.memory_space<vmem>>, %arg2: memref<128x128xbf16, #tpu.memory_space<vmem>>, %arg3: memref<1x128xf32, #tpu.memory_space<vmem>>, %arg4: memref<128x128xbf16, #tpu.memory_space<vmem>>, %arg5: memref<1x128xf32, #tpu.memory_space<vmem>>, %arg6: memref<8x128xf32, #tpu.memory_space<vmem>>) attributes {dimension_semantics = [#tpu.dimension_semantics<parallel>], iteration_bounds = array<i64: 1>, scalar_prefetch = 0 : i64, scratch_operands = 0 : i64, tpu.core_type = #tpu.core_type<tc>, window_params = [{transform_indices = @transform_0, window_bounds = array<i64: 8, 128>}, {pipeline_mode = #tpu.pipeline_mode<synchronous>, transform_indices = @transform_1, window_bounds = array<i64: 128, 128>}, {pipeline_mode = #tpu.pipeline_mode<synchronous>, transform_indices = @transform_2, window_bounds = array<i64: 1, 128>}, {pipeline_mode = #tpu.pipeline_mode<synchronous>, transform_indices = @transform_3, window_bounds = array<i64: 128, 128>}, {pipeline_mode = #tpu.pipeline_mode<synchronous>, transform_indices = @transform_4, window_bounds = array<i64: 1, 128>}, {transform_indices = @transform_5, window_bounds = array<i64: 8, 128>}]} {
    %c0 = arith.constant 0 : index
    %c0_0 = arith.constant 0 : index
    %0 = vector.load %arg1[%c0, %c0_0] : memref<8x128xbf16, #tpu.memory_space<vmem>>, vector<8x128xbf16>
    %c0_1 = arith.constant 0 : index
    %c0_2 = arith.constant 0 : index
    %1 = vector.load %arg2[%c0_1, %c0_2] : memref<128x128xbf16, #tpu.memory_space<vmem>>, vector<128x128xbf16>
    %cst = arith.constant dense<0.000000e+00> : vector<8x128xf32>
    %2 = tpu.matmul %0, %1, %cst {dimension_numbers = #tpu.dot_dimension_numbers<[1], [0], [0], [1], [0, 0, 1, 1], [], []>} : vector<8x128xbf16>, vector<128x128xbf16>, vector<8x128xf32> -> vector<8x128xf32>
    %c0_3 = arith.constant 0 : index
    %c0_4 = arith.constant 0 : index
    %3 = vector.load %arg3[%c0_3, %c0_4] : memref<1x128xf32, #tpu.memory_space<vmem>>, vector<1x128xf32>
    %4 = vector.broadcast %3 : vector<1x128xf32> to vector<8x128xf32>
    %5 = arith.addf %2, %4 : vector<8x128xf32>
    %cst_5 = arith.constant 0.000000e+00 : f32
    %6 = vector.broadcast %cst_5 : f32 to vector<8x128xf32>
    %7 = arith.maximumf %5, %6 : vector<8x128xf32>
    %8 = arith.truncf %7 : vector<8x128xf32> to vector<8x128xbf16>
    %c0_6 = arith.constant 0 : index
    %c0_7 = arith.constant 0 : index
    %9 = vector.load %arg4[%c0_6, %c0_7] : memref<128x128xbf16, #tpu.memory_space<vmem>>, vector<128x128xbf16>
    %cst_8 = arith.constant dense<0.000000e+00> : vector<8x128xf32>
    %10 = tpu.matmul %8, %9, %cst_8 {dimension_numbers = #tpu.dot_dimension_numbers<[1], [0], [0], [1], [0, 0, 1, 1], [], []>} : vector<8x128xbf16>, vector<128x128xbf16>, vector<8x128xf32> -> vector<8x128xf32>
    %c0_9 = arith.constant 0 : index
    %c0_10 = arith.constant 0 : index
    %11 = vector.load %arg5[%c0_9, %c0_10] : memref<1x128xf32, #tpu.memory_space<vmem>>, vector<1x128xf32>
    %12 = vector.broadcast %11 : vector<1x128xf32> to vector<8x128xf32>
    %13 = arith.addf %10, %12 : vector<8x128xf32>
    %c0_11 = arith.constant 0 : index
    %c0_12 = arith.constant 0 : index
    %14 = vector.load %arg6[%c0_11, %c0_12] : memref<8x128xf32, #tpu.memory_space<vmem>>, vector<8x128xf32>
    tpu.vector_store %arg6[%c0_11, %c0_12], %13 {strides = array<i32>} : memref<8x128xf32, #tpu.memory_space<vmem>>, vector<8x128xf32>,
    return
  }
  func.func @transform_0(%arg0: i32) -> (i32, i32) {
    %c0_i32 = arith.constant 0 : i32
    %c0_i32_0 = arith.constant 0 : i32
    return %arg0, %c0_i32 : i32, i32
  }
  func.func @transform_1(%arg0: i32) -> (i32, i32) {
    %c0_i32 = arith.constant 0 : i32
    %c0_i32_0 = arith.constant 0 : i32
    %c0_i32_1 = arith.constant 0 : i32
    return %c0_i32, %c0_i32_0 : i32, i32
  }
  func.func @transform_2(%arg0: i32) -> (i32, i32) {
    %c0_i32 = arith.constant 0 : i32
    %c0_i32_0 = arith.constant 0 : i32
    %c0_i32_1 = arith.constant 0 : i32
    return %c0_i32, %c0_i32_0 : i32, i32
  }
  func.func @transform_3(%arg0: i32) -> (i32, i32) {
    %c0_i32 = arith.constant 0 : i32
    %c0_i32_0 = arith.constant 0 : i32
    %c0_i32_1 = arith.constant 0 : i32
    return %c0_i32, %c0_i32_0 : i32, i32
  }
  func.func @transform_4(%arg0: i32) -> (i32, i32) {
    %c0_i32 = arith.constant 0 : i32
    %c0_i32_0 = arith.constant 0 : i32
    %c0_i32_1 = arith.constant 0 : i32
    return %c0_i32, %c0_i32_0 : i32, i32
  }
  func.func @transform_5(%arg0: i32) -> (i32, i32) {
    %c0_i32 = arith.constant 0 : i32
    %c0_i32_0 = arith.constant 0 : i32
    return %arg0, %c0_i32 : i32, i32
  }
}

</mosaic_0001>

<bundles_post_ra>
// kernel: tpu_custom_call.1
= control target key start
LH: loop header
LB: loop body
LE: loop exit
PB: predicated region body
PF: predicated region fallthrough
CT: control target
= control target key end

     0   :  { %10 = vsyncpa [#allocation3], 0  ;;  %s494_s0 = inlined_call_operand.hbm [shape: bf16[8,128], index: 0, kind: input, shape index: {}]   ;;  %s495_s1 = inlined_call_operand.hbm [shape: bf16[128,128], index: 1, kind: input, shape index: {}]   ;;  %s496_s2 = inlined_call_operand.vmem [shape: f32[1,128], index: 2, kind: input, shape index: {}]   ;;  %s497_s3 = inlined_call_operand.hbm [shape: bf16[128,128], index: 3, kind: input, shape index: {}]   ;;  %s498_s4 = inlined_call_operand.vmem [shape: f32[1,128], index: 4, kind: input, shape index: {}]   ;;  %s499_s5 = inlined_call_operand.hbm [shape: f32[8,128], index: 5, kind: output, shape index: {}]  }
   0x1   :  { %11 = vsyncpa [#allocation6], 0  ;;  %s28_s20 = sshll.u32 %s495_s1, 4  ;;  %s29_s20 = int_to_ptr.hbm [resolvable:$true] %s28_s20 }
   0x2   :  { %12 = vsyncpa [#allocation4], 0  ;;  %s440_s21 = smov [#allocation5]   ;;  %s18_s25 = sshll.u32 %s494_s0, 4  ;;  %s19_s25 = int_to_ptr.hbm [resolvable:$true] %s18_s25 }
   0x3   :  { %s30_s22 = sshll.u32 %s440_s21, 4  ;;  %s441_s26 = smov 64   ;;  %s31_s22 = int_to_ptr.vmem [resolvable:$true] %s30_s22 }
   0x4   :  { %s442_s27 = smov 4   ;;  %s443_s28 = smov [#allocation2]  }
   0x5   :  { %36 = dma.hbm_to_vmem [thread:$0]  %s29_s20, 1024, %s31_s22, [#allocation6], %s441_s26, %s441_s26, %s442_s27  }
   0x6   :  { %s20_s29 = sshll.u32 %s443_s28, 4  ;;  %s43_s7 = sshll.u32 %s497_s3, 4  ;;  %s21_s29 = int_to_ptr.vmem [resolvable:$true] %s20_s29  ;;  %s44_s7 = int_to_ptr.hbm [resolvable:$true] %s43_s7 }
   0x7   :  { %23 = dma.hbm_to_vmem [thread:$0]  %s19_s25, 64, %s21_s29, [#allocation3]  }
   0x8   :  { %s444_s1 = smov [#allocation7]  }
   0x9   :  { %s45_s8 = sshll.u32 %s444_s1, 4  ;;  %s46_s8 = int_to_ptr.vmem [resolvable:$true] %s45_s8 }
   0xa   :  { %51 = dma.hbm_to_vmem [thread:$0]  %s44_s7, 1024, %s46_s8, [#allocation6], %s441_s26, %s441_s26, %s442_s27  }
   0xb   :  { %434 = dma.done.wait [#allocation3], 64  }
   0xc   :  { %435 = vsyncadd [#allocation3], 4294967232 }
   0xd   :  { %436 = dma.done.wait [#allocation6], 2048  }
   0xe   :  { %437 = vsyncadd [#allocation6], 4294965248  ;;  %v321_v0 = vld [vmem:[#allocation5 + $0x38] sm:$0xff]  ;;  %v320_v1 = vld [vmem:[#allocation5 + $0x30] sm:$0xff]  ;;  %s445_s11 = smov [#allocation8]   ;;  %s239_s15 = sshll.u32 %s499_s5, 4  ;;  %s240_s15 = int_to_ptr.hbm [resolvable:$true] %s239_s15 }
   0xf   :  { %135 = vmatpush.bf16.msra.mxu0 %v321_v0  ;;  %v329_v2 = vld [vmem:[#allocation7 + $0x38] sm:$0xff]  ;;  %v328_v3 = vld [vmem:[#allocation7 + $0x30] sm:$0xff]  ;;  %v319_v4 = vld [vmem:[#allocation5 + $0x28] sm:$0xff]  ;;  %s237_s12 = sshll.u32 %s445_s11, 4  ;;  %s238_s12 = int_to_ptr.vmem [resolvable:$true] %s237_s12 }
  0x10   :  { %218 = vmatpush.bf16.msra.mxu1 %v329_v2  ;;  %v327_v5 = vld [vmem:[#allocation7 + $0x28] sm:$0xff]  ;;  %v318_v6 = vld [vmem:[#allocation5 + $0x20] sm:$0xff]  ;;  %v317_v8 = vld [vmem:[#allocation5 + $0x18] sm:$0xff] }
  0x11   :  { %v326_v7 = vld [vmem:[#allocation7 + $0x20] sm:$0xff]  ;;  %v325_v9 = vld [vmem:[#allocation7 + $0x18] sm:$0xff]  ;;  %v316_v10 = vld [vmem:[#allocation5 + $0x10] sm:$0xff] }
  0x12   :  { %v324_v11 = vld [vmem:[#allocation7 + $0x10] sm:$0xff]  ;;  %v315_v12 = vld [vmem:[#allocation5 + $0x8] sm:$0xff]  ;;  %v314_v13 = vld [vmem:[#allocation5] sm:$0xff] }
  0x13   :  { %136 = vmatpush.bf16.msra.mxu0 %v320_v1  ;;  %v66_v14 = vld [vmem:[#allocation2] sm:$0xf]  ;;  %v323_v15 = vld [vmem:[#allocation7 + $0x8] sm:$0xff]  ;;  %v322_v16 = vld [vmem:[#allocation7] sm:$0xff] }
  0x14   :  { %219 = vmatpush.bf16.msra.mxu1 %v328_v3  ;;  %v336_v17 = vld [vmem:[%s496_s2] ss:$0 sm:$0xff] }
  0x15   :  { %v337_v23 = vld [vmem:[%s498_s4] ss:$0 sm:$0xff] }
  0x17   :  { %137 = vmatpush.bf16.msra.mxu0 %v319_v4 }
  0x18   :  { %220 = vmatpush.bf16.msra.mxu1 %v327_v5 }
  0x1b   :  { %138 = vmatpush.bf16.msra.mxu0 %v318_v6 }
  0x1c   :  { %221 = vmatpush.bf16.msra.mxu1 %v326_v7 }
  0x1f   :  { %139 = vmatpush.bf16.msra.mxu0 %v317_v8 }
  0x20   :  { %222 = vmatpush.bf16.msra.mxu1 %v325_v9 }
  0x23   :  { %140 = vmatpush.bf16.msra.mxu0 %v316_v10 }
  0x24   :  { %223 = vmatpush.bf16.msra.mxu1 %v324_v11 }
  0x27   :  { %141 = vmatpush.bf16.msra.mxu0 %v315_v12 }
  0x28   :  { %224 = vmatpush.bf16.msra.mxu1 %v323_v15 }
  0x2b   :  { %142 = vmatpush.bf16.msra.mxu0 %v314_v13 }
  0x2c   :  { %225 = vmatpush.bf16.msra.mxu1 %v322_v16 }
  0x2e   :  { %143 = vmatmul.bf16.vlgmr.msra.gmra.mxu0 %v66_v14 }
  0xab   :  { %v144_v18 = vpop.f32.mrf.mxu0 }
  0xac   :  { %v145_v19 = vadd.f32 %v336_v17, %v144_v18 }
  0xae   :  { %v148_v20 = vmax.f32 %v145_v19, 0.0 }
  0xb0   :  { %v149_v21 = vpack.c.bf16 %v148_v20, %v148_v20 }
  0xb2   :  { %226 = vmatmul.bf16.vlgmr.msra.gmra.mxu1 %v149_v21 }
  0xb3   :  { %v146_v22 = vpop.f32.mrf.mxu0 }
 0x12f   :  { %v227_v24 = vpop.f32.mrf.mxu1 }
 0x130   :  { %v228_v25 = vadd.f32 %v337_v23, %v227_v24 }
 0x132   :  { %231 = vst [vmem:[#allocation8] sm:$0xff] %v228_v25 }
 0x133   :  { %242 = dma.vmem_to_hbm [thread:$0]  %s238_s12, 128, %s240_s15, [#allocation4]  }
 0x137   :  { %v229_v26 = vpop.f32.mrf.mxu1 }
 0x138   :  { %438 = dma.done.wait [#allocation4], 128  }
 0x139   :  { %439 = vsyncadd [#allocation4], 4294967168 }
 0x13a   :  { %247 = vsyncpa [#allocation3], 1 }
 0x13b   :  { %248 = vsyncpa [#allocation6], 1 }
 0x13c   :  { %249 = vsyncpa [#allocation4], 1 }

</bundles_post_ra>
